<compile_context>
chip_gen: v5e
topology: v5e:2x2
jax: 0.10.0
libtpu: 0.0.40
codegen_flags: <defaults>
</compile_context>

<pallas_src>
import functools

import jax
import jax.numpy as jnp
from jax import lax
from jax.experimental import pallas as pl
from jax.experimental.pallas import tpu as pltpu


_LANE = 128
_MIB = 1024 * 1024


def _layernorm_kernel(x_ref, g_ref, b_ref, o_ref, *, eps, chunk, n_chunks,
                      norm_dtype):
    # x_ref / o_ref: (Nb, C, T) blocks; g_ref / b_ref: (1, C, 1) full params.
    # Hoist per-channel params out of the chunk loop (JAX does not CSE
    # broadcast_in_dim, so do the load/cast exactly once per grid step).
    g = g_ref[...].astype(norm_dtype)                       # (1, C, 1)
    b = b_ref[...].astype(norm_dtype)

    def body(ci, carry):
        start = pl.multiple_of(ci * chunk, _LANE)
        x = x_ref[:, :, pl.ds(start, chunk)]                # (Nb, C, chunk)
        xf = x.astype(jnp.float32)
        # Two-pass (centered) statistics in f32 == torch.var(unbiased=False).
        mean = jnp.mean(xf, axis=1, keepdims=True)          # (Nb, 1, chunk)
        cen = xf - mean
        var = jnp.mean(cen * cen, axis=1, keepdims=True)
        inv = lax.rsqrt(var + eps)                          # EUP slot
        # Elementwise normalize in norm_dtype (bf16 for bf16 inputs).
        out = cen.astype(norm_dtype) * inv.astype(norm_dtype) * g + b
        o_ref[:, :, pl.ds(start, chunk)] = out.astype(o_ref.dtype)
        return carry

    lax.fori_loop(0, n_chunks, body, 0, unroll=min(n_chunks, 8))


def _vmem_budget():
    """(working-set budget, vmem_limit_bytes) sized per TPU generation."""
    try:
        cap = int(getattr(pltpu.get_tpu_info(), "vmem_capacity_bytes",
                          64 * _MIB))
    except Exception:  # query unavailable: assume the smallest VMEM (v7x)
        cap = 64 * _MIB
    budget = min(48 * _MIB, int(cap * 0.6))   # double-buffered in+out blocks
    limit = min(int(cap * 0.85), 100 * _MIB)  # scoped-VMEM limit we request
    return budget, limit


def _pick_tiles(n, c, hw, itemsize, budget, target_block_bytes=2 * _MIB):
    """Choose (Nb, T_hw, chunk) for blocks of shape (Nb, C, T_hw)."""
    hw_pad = pl.cdiv(hw, _LANE) * _LANE

    # Lane tile: as many 128-lane groups as fit the target block size.
    t_hw = (target_block_bytes // max(1, c * itemsize)) // _LANE * _LANE
    t_hw = max(_LANE, min(t_hw, hw_pad))

    # If a full (padded) HW row is still small, block over N as well.
    nb = 1
    if t_hw >= hw_pad:
        t_hw = hw_pad
        nb = max(1, min(n, target_block_bytes // max(1, c * hw_pad * itemsize)))

    # Fit the double-buffered working set (2 x (in + out) blocks) in VMEM.
    def working_set(nb_, t_):
        return 4 * nb_ * c * t_ * itemsize

    while working_set(nb, t_hw) > budget and nb > 1:
        nb = max(1, nb // 2)
    while working_set(nb, t_hw) > budget and t_hw > _LANE:
        t_hw = max(_LANE, (t_hw // 2) // _LANE * _LANE)

    # Keep >= 4 grid steps when possible so v7x megacore has work for both TCs.
    def steps(nb_, t_):
        return pl.cdiv(n, nb_) * pl.cdiv(hw, t_)

    while steps(nb, t_hw) < 4 and nb > 1:
        nb = max(1, nb // 2)
    while steps(nb, t_hw) < 4 and t_hw > _LANE:
        t_hw = max(_LANE, (t_hw // 2) // _LANE * _LANE)

    # Inner chunking bounds vreg pressure; T must be a multiple of the chunk.
    chunk = min(512, t_hw)
    t_hw = max(chunk, (t_hw // chunk) * chunk)
    return nb, t_hw, chunk


def layer_norm(x, g, b, eps=1e-5):
    """x: (N, C, H, W); g, b: (1, C, 1, 1). Channel-wise LayerNorm (NCHW)."""
    N, C, H, W = x.shape
    HW = H * W
    x3 = x.reshape(N, C, HW)
    g3 = g.reshape(1, C, 1)
    b3 = b.reshape(1, C, 1)

    budget, vmem_limit = _vmem_budget()
    nb, t_hw, chunk = _pick_tiles(N, C, HW, x.dtype.itemsize, budget)
    n_chunks = t_hw // chunk
    grid = (pl.cdiv(N, nb), pl.cdiv(HW, t_hw))

    # Stats in f32; elementwise normalize in bf16 only for bf16 inputs
    # (cheaper on v6e / v7x; v5e falls back internally, f32 path unchanged).
    norm_dtype = jnp.bfloat16 if x.dtype == jnp.bfloat16 else jnp.float32

    kernel = functools.partial(
        _layernorm_kernel, eps=eps, chunk=chunk, n_chunks=n_chunks,
        norm_dtype=norm_dtype)

    # Memory-bound kernel: give XLA an accurate roofline hint.
    cost = pl.CostEstimate(
        flops=8 * N * C * HW,
        bytes_accessed=2 * N * C * HW * x.dtype.itemsize,
        transcendentals=N * HW,
    )

    out3 = pl.pallas_call(
        kernel,
        out_shape=jax.ShapeDtypeStruct((N, C, HW), x.dtype),
        grid_spec=pltpu.PrefetchScalarGridSpec(
            num_scalar_prefetch=0,
            grid=grid,
            in_specs=[
                pl.BlockSpec((nb, C, t_hw), lambda i, j: (i, 0, j)),
                pl.BlockSpec((1, C, 1), lambda i, j: (0, 0, 0)),
                pl.BlockSpec((1, C, 1), lambda i, j: (0, 0, 0)),
            ],
            out_specs=pl.BlockSpec((nb, C, t_hw), lambda i, j: (i, 0, j)),
        ),
        compiler_params=pltpu.CompilerParams(
            dimension_semantics=("parallel", "parallel"),
            vmem_limit_bytes=vmem_limit,
        ),
        cost_estimate=cost,
    )(x3, g3, b3)

    return out3.reshape(N, C, H, W)


def _reference(x, g, b, eps):
    mean = jnp.mean(x, axis=1, keepdims=True)
    var = jnp.mean((x - mean) ** 2, axis=1, keepdims=True)
    return (x - mean) / jnp.sqrt(var + eps) * g + b


if __name__ == "__main__":
    key = jax.random.PRNGKey(0)
    eps = 1e-5

    # Primary small shape implied by the module's NCHW usage.
    N, C, H, W = 2, 4, 16, 16
    x = jax.random.normal(key, (N, C, H, W), dtype=jnp.float32)
    g = jnp.ones((1, C, 1, 1), dtype=jnp.float32)   # torch.ones(1, dim, 1, 1)
    b = jnp.zeros((1, C, 1, 1), dtype=jnp.float32)  # torch.zeros(1, dim, 1, 1)

    out = jax.block_until_ready(layer_norm(x, g, b, eps=eps))
    ref = _reference(x, g, b, eps)
    assert jnp.allclose(out, ref, atol=1e-5, rtol=1e-5), "mismatch on 16x16"

    # Non-multiple-of-128 spatial extent exercises the cdiv / padded-block path.
    x2 = jax.random.normal(jax.random.PRNGKey(1), (2, 4, 10, 10),
                           dtype=jnp.float32)
    out2 = jax.block_until_ready(layer_norm(x2, g, b, eps=eps))
    ref2 = _reference(x2, g, b, eps)
    assert jnp.allclose(out2, ref2, atol=1e-5, rtol=1e-5), "mismatch on 10x10"

    print("KERNEL_OK")
</pallas_src>

<mosaic_0001>
module attributes {stable_mosaic.version = 11 : i64} {
  func.func @_layernorm_kernel(%arg0: i32, %arg1: i32, %arg2: memref<1x4x128xf32, #tpu.memory_space<vmem>>, %arg3: memref<1x4x1xf32, #tpu.memory_space<vmem>>, %arg4: memref<1x4x1xf32, #tpu.memory_space<vmem>>, %arg5: memref<1x4x128xf32, #tpu.memory_space<vmem>>) attributes {dimension_semantics = [#tpu.dimension_semantics<parallel>, #tpu.dimension_semantics<parallel>], iteration_bounds = array<i64: 2, 2>, scalar_prefetch = 0 : i64, scratch_operands = 0 : i64, tpu.core_type = #tpu.core_type<tc>, window_params = [{transform_indices = @transform_0, window_bounds = array<i64: 1, 4, 128>}, {pipeline_mode = #tpu.pipeline_mode<synchronous>, transform_indices = @transform_1, window_bounds = array<i64: 1, 4, 1>}, {pipeline_mode = #tpu.pipeline_mode<synchronous>, transform_indices = @transform_2, window_bounds = array<i64: 1, 4, 1>}, {transform_indices = @transform_3, window_bounds = array<i64: 1, 4, 128>}]} {
    %c0 = arith.constant 0 : index
    %c0_0 = arith.constant 0 : index
    %c0_1 = arith.constant 0 : index
    %0 = vector.load %arg3[%c0, %c0_0, %c0_1] : memref<1x4x1xf32, #tpu.memory_space<vmem>>, vector<1x4x1xf32>
    %c0_2 = arith.constant 0 : index
    %c0_3 = arith.constant 0 : index
    %c0_4 = arith.constant 0 : index
    %1 = vector.load %arg4[%c0_2, %c0_3, %c0_4] : memref<1x4x1xf32, #tpu.memory_space<vmem>>, vector<1x4x1xf32>
    %c0_i32 = arith.constant 0 : i32
    %c128_i32 = arith.constant 128 : i32
    %2 = arith.muli %c0_i32, %c128_i32 : i32
    %3 = tpu.assume_multiple %2, 128 : i32
    %c0_5 = arith.constant 0 : index
    %c0_6 = arith.constant 0 : index
    %4 = arith.index_cast %3 : i32 to index
    %5 = vector.load %arg2[%c0_5, %c0_6, %4] : memref<1x4x128xf32, #tpu.memory_space<vmem>>, vector<1x4x128xf32>
    %cst = arith.constant dense<0.000000e+00> : vector<1x128xf32>
    %6 = vector.multi_reduction <add>, %5, %cst [1] : vector<1x4x128xf32> to vector<1x128xf32>
    %7 = vector.shape_cast %6 : vector<1x128xf32> to vector<1x1x128xf32>
    %cst_7 = arith.constant 4.000000e+00 : f32
    %8 = vector.broadcast %cst_7 : f32 to vector<1x1x128xf32>
    %9 = arith.divf %7, %8 : vector<1x1x128xf32>
    %10 = vector.broadcast %9 : vector<1x1x128xf32> to vector<1x4x128xf32>
    %11 = arith.subf %5, %10 : vector<1x4x128xf32>
    %12 = arith.mulf %11, %11 : vector<1x4x128xf32>
    %cst_8 = arith.constant dense<0.000000e+00> : vector<1x128xf32>
    %13 = vector.multi_reduction <add>, %12, %cst_8 [1] : vector<1x4x128xf32> to vector<1x128xf32>
    %14 = vector.shape_cast %13 : vector<1x128xf32> to vector<1x1x128xf32>
    %cst_9 = arith.constant 4.000000e+00 : f32
    %15 = vector.broadcast %cst_9 : f32 to vector<1x1x128xf32>
    %16 = arith.divf %14, %15 : vector<1x1x128xf32>
    %cst_10 = arith.constant 9.99999974E-6 : f32
    %17 = vector.broadcast %cst_10 : f32 to vector<1x1x128xf32>
    %18 = arith.addf %16, %17 : vector<1x1x128xf32>
    %19 = math.rsqrt %18 : vector<1x1x128xf32>
    %20 = vector.broadcast %19 : vector<1x1x128xf32> to vector<1x4x128xf32>
    %21 = arith.mulf %11, %20 : vector<1x4x128xf32>
    %22 = vector.broadcast %0 : vector<1x4x1xf32> to vector<1x4x128xf32>
    %23 = arith.mulf %21, %22 : vector<1x4x128xf32>
    %24 = vector.broadcast %1 : vector<1x4x1xf32> to vector<1x4x128xf32>
    %25 = arith.addf %23, %24 : vector<1x4x128xf32>
    %c0_11 = arith.constant 0 : index
    %c0_12 = arith.constant 0 : index
    %26 = arith.index_cast %3 : i32 to index
    %27 = vector.load %arg5[%c0_11, %c0_12, %26] : memref<1x4x128xf32, #tpu.memory_space<vmem>>, vector<1x4x128xf32>
    tpu.vector_store %arg5[%c0_11, %c0_12, %26], %25 {strides = array<i32>} : memref<1x4x128xf32, #tpu.memory_space<vmem>>, vector<1x4x128xf32>,
    %c1_i32 = arith.constant 1 : i32
    return
  }
  func.func @transform_0(%arg0: i32, %arg1: i32) -> (i32, i32, i32) {
    %c0_i32 = arith.constant 0 : i32
    %c0_i32_0 = arith.constant 0 : i32
    return %arg0, %c0_i32, %arg1 : i32, i32, i32
  }
  func.func @transform_1(%arg0: i32, %arg1: i32) -> (i32, i32, i32) {
    %c0_i32 = arith.constant 0 : i32
    %c0_i32_0 = arith.constant 0 : i32
    %c0_i32_1 = arith.constant 0 : i32
    %c0_i32_2 = arith.constant 0 : i32
    return %c0_i32, %c0_i32_0, %c0_i32_1 : i32, i32, i32
  }
  func.func @transform_2(%arg0: i32, %arg1: i32) -> (i32, i32, i32) {
    %c0_i32 = arith.constant 0 : i32
    %c0_i32_0 = arith.constant 0 : i32
    %c0_i32_1 = arith.constant 0 : i32
    %c0_i32_2 = arith.constant 0 : i32
    return %c0_i32, %c0_i32_0, %c0_i32_1 : i32, i32, i32
  }
  func.func @transform_3(%arg0: i32, %arg1: i32) -> (i32, i32, i32) {
    %c0_i32 = arith.constant 0 : i32
    %c0_i32_0 = arith.constant 0 : i32
    return %arg0, %c0_i32, %arg1 : i32, i32, i32
  }
}

</mosaic_0001>

<bundles_post_ra>
// kernel: tpu_custom_call.1
= control target key start
LH: loop header
LB: loop body
LE: loop exit
PB: predicated region body
PF: predicated region fallthrough
CT: control target
= control target key end

     0   :  { %8 = vsyncpa [#allocation3], 0  ;;  %s769_s0 = inlined_call_operand.hbm [shape: f32[2,4,256], index: 0, kind: input, shape index: {}]   ;;  %s770_s1 = inlined_call_operand.vmem [shape: f32[1,4,1], index: 1, kind: input, shape index: {}]   ;;  %s771_s2 = inlined_call_operand.vmem [shape: f32[1,4,1], index: 2, kind: input, shape index: {}]   ;;  %s772_s3 = inlined_call_operand.hbm [shape: f32[2,4,256], index: 3, kind: output, shape index: {}]  }
   0x1   :  { %10 = vsyncpa [#allocation3 + $0x1], 0 }
   0x2   :  { %11 = vsyncpa [#allocation4], 0 }
   0x3   :  { %13 = vsyncpa [#allocation4 + $0x1], 0  ;;  %s615_s12 = smov 0   ;;  %s617_s13 = smov 0  }
   0x4   :  { %s619_s14 = smov 0   ;;  %s621_s15 = smov 0  }
   0x5   :  { %s623_s16 = smov 0   ;;  %s625_s17 = smov 0  }
   0x6   :  { %s627_s18 = smov 0   ;;  %s629_s19 = smov 0  }
   0x7 LB: > { %s363_s20 = sadd.s32 4294967295, %s591_s19   ;;  %s364_s21 = sadd.s32 4294967294, %s591_s19   ;;  %s591_s19 = sphi %s629_s19, %s19_s19   ;;  %s587_s18 = sphi %s627_s18, %s786_s18   ;;  %s583_s17 = sphi %s625_s17, %s785_s17   ;;  %s579_s16 = sphi %s623_s16, %s784_s16   ;;  %s575_s15 = sphi %s621_s15, %s783_s15   ;;  %s571_s14 = sphi %s619_s14, %s782_s14   ;;  %s567_s13 = sphi %s617_s13, %s781_s13   ;;  %s563_s12 = sphi %s615_s12, %s780_s12  }
   0x8   : > { %s28_s22 = sadd.s32 1, %s583_s17  ;;  %s31_s23 = sadd.s32 1, %s587_s18 }
   0x9   : > { %p29_p0 = scmp.ge.s32.totalorder %s28_s22, 2  ;;  %s40_s24 = sadd.s32 1, %s571_s14 }
   0xa   : > { %p47_p1 = scmp.ne.s32.totalorder %s571_s14, %s567_s13  ;;  %p48_p2 = scmp.eq.s32.totalorder %s591_s19, 0 }
   0xb   : > { %s788_s22 = smov (%p29_p0, %s28_s22), 0  ;;  %s790_s23 = smov (!%p29_p0, %s31_s23), %s587_s18 }
   0xc   : > { %s36_s25 = ssub.s32 %s583_s17, %s788_s22  ;;  %p668_p3 = por %p48_p2, %p47_p1 }
   0xd   : > { %p33_p4 = scmp.ge.s32.totalorder %s790_s23, 2  ;;  %p53_p5 = scmp.ne.s32.totalorder %s567_s13, %s563_s12 }
   0xe   : > { %p54_p6 = scmp.eq.s32.totalorder %s363_s20, 0  ;;  %p121_p7 = scmp.eq.s32.totalorder %s363_s20, 3 }
   0xf   : > { %s792_s23 = smov (%p33_p4, %s790_s23), 0  ;;  %p127_p10 = scmp.eq.s32.totalorder %s364_s21, 3 }
  0x10   : > { %775 = sst [smem:[#allocation8_spill]] %s792_s23  ;;  %p676_p8 = por %p54_p6, %p53_p5 }
  0x11   : > { %p680_p9 = por %p121_p7, %p47_p1  ;;  %s35_s29 = ssub.s32 %s587_s18, %s792_s23 }
  0x12   : > { %s37_s30 = sor.u32 %s36_s25, %s35_s29  ;;  %p686_p12 = por %p127_p10, %p53_p5 }
  0x13   : > { %p38_p11 = scmp.eq.s32.totalorder %s37_s30, 0  ;;  %p390_p13 = scmp.lt.s32.totalorder %s591_s19, 4 }
  0x14   : > { %s153_s5 = sand.u32 1, %s571_s14   ;;  %s368_s8 = sshll.u32 %s587_s18, 1 }
  0x15   : > { %s693_s6 = scalar_select %p38_p11, %s571_s14, %s40_s24  }
  0x16   : > { %s367_s7 = sshll.u32 %s153_s5, 2  ;;  %s161_s9 = sadd.s32 %s583_s17, %s368_s8 }
  0x17   : > { %s157_s10 = scalar_lea.vmem [#allocation2], %s367_s7  ;;  %s369_s20 = sshll.u32 %s161_s9, 2 }
  0x18   : > { %s167_s11 = sshll.u32 %s157_s10, 4  ;;  %s163_s29 = scalar_lea.hbm %s769_s0, %s369_s20  ;;  %s168_s11 = int_to_ptr.vmem [resolvable:$true] %s167_s11 }
  0x19   : > { %p383_p0 = pnand %p390_p13, %p668_p3  ;;  %s165_s30 = sshll.u32 %s163_s29, 4  ;;  %s166_s30 = int_to_ptr.hbm [resolvable:$true] %s165_s30 }
  0x1a   : > { %p370_p1 = scmp.ge.s32.totalorder %s591_s19, 1  ;;  %s154_s23 = scalar_lea.sflag [#allocation3], %s153_s5 }
  0x1b   : > { %385 = dma.hbm_to_vmem [thread:$0]  (!%p383_p0), %s166_s30, 64, %s168_s11, %s154_s23  }
  0x1c   : > { %p172_p2 = scmp.lt.s32.totalorder %s591_s19, 5 }
  0x1e   : > { %p173_p4 = pnand %p370_p1, %p172_p2 }
  0x1f   : > { %s705_s24 = sand.u32 (!%p173_p4), 1, %s567_s13  }
  0x20   : > { %176 = sbr.rel (%p173_p4) target bundleno = 168 (0xa8), region = 32  ;;  %s371_s7 = sshll.u32 (!%p173_p4), %s705_s24, 2 }
  0x21   : > { %s179_s8 = scalar_lea.sflag (!%p173_p4), [#allocation3], %s705_s24  ;;  %s182_s26 = scalar_lea.vmem (!%p173_p4), [#allocation2], %s371_s7 }
  0x25   : > { %554 = dma.done.wait (%p676_p8), %s179_s8, 64  }
  0x26   : > { %556 = vsyncadd (%p676_p8), %s179_s8, 4294967232  ;;  %v593_v0 = vmov 0   ;;  %v206_v1 = vld [vmem:[%s770_s1] sm:$0xf]  ;;  %vm209_vm0 = vcmask 1043456   ;;  %v594_v4 = vmov 4.0  }
  0x27   : > { %458 = vset.pattern.permute.xlu0 %v593_v0  ;;  %v207_v2 = vld [vmem:[%s771_s2] sm:$0xf]  ;;  %459 = vrcp.f32 %v594_v4  ;;  %s374_s27 = sshll.u32 %s579_s16, 1  ;;  %s205_s30 = scalar_lea.vmem [#allocation5], %s371_s7 }
  0x28   : > { %249 = vperm.xlu0 %458, %v206_v1   ;;  %v208_v3 = vld [vmem:[%s182_s26] sm:$0xf]  ;;  %s271_s11 = sadd.s32 %s575_s15, %s374_s27  ;;  %s275_s8 = sshll.u32 %s205_s30, 4  ;;  %s276_s8 = int_to_ptr.vmem [resolvable:$true] %s275_s8 }
  0x29   : > { %v210_v5 = vsel %vm209_vm0, %v208_v3, 0.0  ;;  %s375_s20 = sshll.u32 %s271_s11, 2  ;;  %s261_s15 = scalar_lea.sflag [#allocation4], %s705_s24 }
  0x2a   : > { %v211_v6 = vrot.slane %v210_v5, 4  ;;  %s273_s29 = scalar_lea.hbm %s772_s3, %s375_s20  ;;  %s513_s7 = scalar_lea.hbm %s772_s3, 16 }
  0x2b   : > { %s277_s26 = sshll.u32 %s273_s29, 4  ;;  %s278_s26 = int_to_ptr.hbm [resolvable:$true] %s277_s26 }
  0x2c   : > { %v212_v8 = vadd.f32 %v211_v6, %v210_v5  ;;  %s507_s16 = sshra.s32 %s278_s26, 4  ;;  %s508_s16 = int_to_ptr.hbm [resolvable:$true] %s507_s16 }
  0x2d   : > { %v460_v7 = vpop.eup %459  ;;  %s509_s23 = scalar_lea.hbm %s508_s16, 4  ;;  %p514_p7 = scmp.lt.s32.totalorder %s508_s16, %s772_s3 }
  0x2e   : > { %v218_v9 = vmul.f32 4.0, %v460_v7  ;;  %v213_v10 = vrot.slane %v212_v8, 2  ;;  %vm222_vm1 = vweird.f32 %v460_v7  ;;  %p510_p3 = scmp.ne.s32.totalorder %s508_s16, %s509_s23  ;;  %p515_p8 = scmp.lt.s32.totalorder %s513_s7, %s509_s23 }
  0x30   : > { %255 = vperm.xlu0 %458, %v207_v2   ;;  %v219_v11 = vsub.f32 1.0, %v218_v9  ;;  %v214_v12 = vadd.f32 %v213_v10, %v212_v8  ;;  %p511_p5 = pnand %p510_p3, %p680_p9  ;;  %p516_p10 = por %p515_p8, %p514_p7 }
  0x32   : > { %v220_v13 = vmul.f32 %v460_v7, %v219_v11  ;;  %v215_v14 = vrot.slane %v214_v12, 1  ;;  %p512_p6 = pneg %p511_p5 }
  0x34   : > { %v221_v15 = vadd.f32 %v460_v7, %v220_v13  ;;  %v216_v16 = vadd.f32 %v215_v14, %v214_v12  ;;  %p517_p11 = pnand %p516_p10, %p512_p6 }
  0x36   : > { %v223_v17 = vsel %vm222_vm1, %v460_v7, %v221_v15 }
  0x37   : > { %v224_v18 = vmul.f32 %v223_v17, %v216_v16 }
  0x39   : > { %v225_v19 = vsub.f32 %v208_v3, %v224_v18 }
  0x3b   : > { %v226_v20 = vmul.f32 %v225_v19, %v225_v19 }
  0x3d   : > { %v227_v21 = vsel %vm209_vm0, %v226_v20, 0.0 }
  0x3e   : > { %v228_v22 = vrot.slane %v227_v21, 4 }
  0x40   : > { %v229_v23 = vadd.f32 %v228_v22, %v227_v21 }
  0x42   : > { %v230_v24 = vrot.slane %v229_v23, 2 }
  0x44   : > { %v231_v25 = vadd.f32 %v230_v24, %v229_v23 }
  0x46   : > { %v232_v26 = vrot.slane %v231_v25, 1 }
  0x48   : > { %v233_v27 = vadd.f32 %v232_v26, %v231_v25 }
  0x4a   : > { %v234_v28 = vmul.f32 %v233_v27, %v223_v17 }
  0x4c   : > { %v235_v29 = vadd.f32 1e-05, %v234_v28 }
  0x4e   : > { %461 = vrsqrt.f32 %v235_v29  ;;  %vm242_vm2 = vweird.f32 %v235_v29 }
  0x54   : > { %v462_v30 = vpop.eup %461 }
  0x55   : > { %v237_v31 = vmul.f32 %v462_v30, %v235_v29  ;;  %vm243_vm3 = vweird.f32 %v462_v30 }
  0x56   : > { %vm244_vm4 = vmor %vm242_vm2, %vm243_vm3 }
  0x57   : > { %v238_v32 = vmul.f32 %v462_v30, %v237_v31 }
  0x59   : > { %v239_v33 = vmul.f32 0.5, %v238_v32 }
  0x5b   : > { %v240_v34 = vsub.f32 1.5, %v239_v33 }
  0x5d   : > { %v241_v35 = vmul.f32 %v462_v30, %v240_v34 }
  0x5f   : > { %v245_v36 = vsel %vm244_vm4, %v462_v30, %v241_v35 }
  0x60   : > { %v246_v38 = vmul.f32 %v245_v36, %v225_v19 }
  0x9a   : > { %v250_v37 = vpop.permute.xlu0 %249 }
  0x9b   : > { %v252_v39 = vmul.f32 %v250_v37, %v246_v38 }
  0xa2   : > { %v256_v40 = vpop.permute.xlu0 %255 }
  0xa3   : > { %v258_v41 = vadd.f32 %v256_v40, %v252_v39 }
  0xa5   : > { %259 = vst [vmem:[%s205_s30] sm:$0xf] %v258_v41 }
  0xa6   : > { %520 = shalt.err (!%p517_p11)
}
  0xa7   : > { %380 = dma.vmem_to_hbm [thread:$0]  (%p680_p9), %s276_s8, 64, %s278_s26, %s261_s15  }
  0xa8 PF: > { %p391_p13 = scmp.ge.s32.totalorder %s591_s19, 2  ;;  %s289_s24 = sand.u32 1, %s563_s12  }
  0xa9   : > { %s290_s11 = scalar_lea.sflag [#allocation4], %s289_s24 }
  0xaa   : > { %p387_p0 = pnand %p391_p13, %p686_p12 }
  0xac   : > { %p388_p1 = pneg %p387_p0 }
  0xae   : > { %558 = dma.done.wait (%p388_p1), %s290_s11, 64  }
  0xaf   : > { %560 = vsyncadd (%p388_p1), %s290_s11, 4294967232  ;;  %s19_s19 = sadd.s32 1, %s591_s19   ;;  %s779_s28 = sld [smem:[#allocation8_spill]] }
  0xb0   : > { %p16_p2 = scmp.ge.s32.totalorder %s19_s19, 6   ;;  %s780_s12 = smov %s567_s13 }
  0xb1   : > { %s781_s13 = smov %s571_s14  ;;  %s782_s14 = smov %s693_s6 }
  0xb2   : > { %s783_s15 = smov %s583_s17  ;;  %s784_s16 = smov %s587_s18 }
  0xb3   : > { %s785_s17 = smov %s788_s22  ;;  %18 = sbr.rel (!%p16_p2) target bundleno = 7 (0x7), region = 77 }
  0xb5   : > { %s786_s18 = smov %s779_s28 }
  0xb8   :  { %296 = vsyncpa [#allocation3], 1 }
  0xb9   :  { %298 = vsyncpa [#allocation3 + $0x1], 1 }
  0xba   :  { %299 = vsyncpa [#allocation4], 1 }
  0xbb   :  { %301 = vsyncpa [#allocation4 + $0x1], 1 }

</bundles_post_ra>
